<compile_context>
chip_gen: v7x
topology: tpu7x:2x2x1
jax: 0.10.0
libtpu: 0.0.40
codegen_flags: <defaults>
</compile_context>

<pallas_src>
import numpy as np
import jax
import jax.numpy as jnp
from jax import lax
from jax.experimental import pallas as pl
from jax.experimental.pallas import tpu as pltpu

NEG_SLOPE = 0.01  # nn.LeakyReLU() default


def _leaky(y):
    # max(y, 0.01*y) == LeakyReLU(y) for slope < 1
    return jnp.maximum(y, NEG_SLOPE * y)


def _round_up(n, m):
    return ((n + m - 1) // m) * m


# ------------------------ 1x1 conv + bias + LeakyReLU ------------------------

def _pointwise_leaky_kernel(x_ref, w_ref, b_ref, o_ref):
    # bf16 x bf16 -> f32 accumulate on the MXU; epilogue in f32.
    y = jnp.dot(x_ref[...], w_ref[...], preferred_element_type=jnp.float32)
    o_ref[...] = _leaky(y + b_ref[...])


def conv1x1_leaky(x_rows, w, b):
    """x_rows: (R, Cin) bf16, w: (Cin, Cout) bf16, b: (Cout,) f32 -> (R, Cout) f32."""
    R0, Cin = x_rows.shape
    Cout = w.shape[1]

    R16 = _round_up(max(R0, 1), 16)          # bf16 sublane packing = 16
    tile = min(8192, R16)                    # big tiles: amortize per-step cost
    if R16 // tile < 4 and R16 >= 64:        # keep >=4 steps (feeds 2 TCs on v7x)
        tile = _round_up(R16 // 4, 16)

    pad = (-R0) % tile
    if pad:
        x_rows = jnp.pad(x_rows, ((0, pad), (0, 0)))
    R = x_rows.shape[0]

    out = pl.pallas_call(
        _pointwise_leaky_kernel,
        out_shape=jax.ShapeDtypeStruct((R, Cout), jnp.float32),
        grid=(R // tile,),
        in_specs=[
            pl.BlockSpec((tile, Cin), lambda i: (i, 0)),
            pl.BlockSpec((Cin, Cout), lambda i: (0, 0)),
            pl.BlockSpec((1, Cout), lambda i: (0, 0)),
        ],
        out_specs=pl.BlockSpec((tile, Cout), lambda i: (i, 0)),
        compiler_params=pltpu.CompilerParams(
            dimension_semantics=("parallel",),
            vmem_limit_bytes=32 * 1024 * 1024),
    )(x_rows, w, b.reshape(1, Cout))
    return out[:R0]


# --------------- 3x3 conv (dilated) + LeakyReLU + BN (+ residual) ------------

def _pick_tile_h(H, W, C):
    """H-tile height bounded by a VMEM byte budget valid on v5e/v6e/v7x."""
    budget = 6 << 20                                   # per-step working set
    per_row = W * C * (2 * 2 + 3 * 4)                  # 2x bf16 slab bufs + ~3 f32 rows
    t = max(8, budget // max(per_row, 1))
    t = min(t, H)
    if H >= 16:
        t = min(t, -(-H // 2))                         # >=2 H-tiles -> more grid steps
    return int(t)


def _make_conv3x3_kernel(tileH, W, C, Cout, dil, with_residual, slab_rows):
    """Per grid step (b, j): manually DMA the halo'd bf16 row slab
    [j*tileH, j*tileH + tileH + 2*dil) of batch b into a double-buffered VMEM
    scratch, accumulate 9 tap-dots into an f32 accumulator, then apply the
    fused bias + LeakyReLU + eval-BN (+ residual) epilogue in f32."""

    def kernel(*refs):
        if with_residual:
            x_hbm, res_ref, w_ref, b_ref, s_ref, t_ref, o_ref, buf, sem = refs
        else:
            x_hbm, w_ref, b_ref, s_ref, t_ref, o_ref, buf, sem = refs

        b = pl.program_id(0)
        j = pl.program_id(1)
        nH = pl.num_programs(1)
        slot = j % 2

        def slab_copy(row0, which):
            return pltpu.make_async_copy(
                x_hbm.at[b, pl.ds(row0, slab_rows), :, :],
                buf.at[which],
                sem.at[which])

        # Prime the pipeline at the first H-tile of every batch (safe under
        # megacore sharding of the batch axis), then prefetch tile j+1 while
        # computing tile j.
        @pl.when(j == 0)
        def _prime():
            slab_copy(j * tileH, slot).start()

        slab_copy(j * tileH, slot).wait()

        @pl.when(j + 1 < nH)
        def _prefetch():
            slab_copy((j + 1) * tileH, 1 - slot).start()

        # 9 accumulated MXU dots (bf16 operands, f32 accumulation) — no
        # materialized (rows, 9*C) im2col matrix.
        acc = jnp.zeros((tileH * W, Cout), jnp.float32)
        for ky in range(3):
            for kx in range(3):
                win = buf[slot, pl.ds(ky * dil, tileH), pl.ds(kx * dil, W), :]
                k = ky * 3 + kx
                acc = acc + jnp.dot(
                    win.reshape(tileH * W, C),
                    w_ref[k * C:(k + 1) * C, :],
                    preferred_element_type=jnp.float32)

        y = _leaky(acc + b_ref[...])            # conv bias + activation (f32)
        y = y * s_ref[...] + t_ref[...]         # eval-mode BatchNorm (f32)
        if with_residual:
            y = y + res_ref[0].reshape(tileH * W, Cout)
        o_ref[0] = y.astype(o_ref.dtype).reshape(tileH, W, Cout)

    return kernel


def conv3x3_fused(x_pad, w_flat, b, scale, shift, *, dil, H, W,
                  residual=None, out_dtype=jnp.float32):
    """x_pad: (B, H+2*dil, W+2*dil, C) bf16 halo-padded NHWC input.
       w_flat: (9*C, Cout) bf16 flattened as [(ky*3+kx)*C + cin, cout].
       Returns (B, H, W, Cout) in out_dtype of BN(LeakyReLU(conv)) [+ residual]."""
    B, Hp, Wp, C = x_pad.shape
    Cout = w_flat.shape[1]

    tileH = _pick_tile_h(H, W, C)
    nH = -(-H // tileH)
    Hgrid = nH * tileH
    extra = Hgrid - H
    if extra:
        # Keep every tile's slab DMA in bounds; output rows are cropped below.
        x_pad = jnp.pad(x_pad, ((0, 0), (0, extra), (0, 0), (0, 0)))
        if residual is not None:
            residual = jnp.pad(residual, ((0, 0), (0, extra), (0, 0), (0, 0)))

    slab_rows = tileH + 2 * dil
    kernel = _make_conv3x3_kernel(tileH, W, C, Cout, dil,
                                  residual is not None, slab_rows)

    in_specs = [pl.BlockSpec(memory_space=pl.ANY)]        # halo'd input: manual DMA
    args = [x_pad]
    if residual is not None:
        in_specs.append(
            pl.BlockSpec((1, tileH, W, Cout), lambda bb, jj: (bb, jj, 0, 0)))
        args.append(residual)
    in_specs += [
        pl.BlockSpec((9 * C, Cout), lambda bb, jj: (0, 0)),
        pl.BlockSpec((1, Cout), lambda bb, jj: (0, 0)),
        pl.BlockSpec((1, Cout), lambda bb, jj: (0, 0)),
        pl.BlockSpec((1, Cout), lambda bb, jj: (0, 0)),
    ]
    args += [w_flat,
             b.reshape(1, Cout).astype(jnp.float32),
             scale.reshape(1, Cout).astype(jnp.float32),
             shift.reshape(1, Cout).astype(jnp.float32)]

    out = pl.pallas_call(
        kernel,
        out_shape=jax.ShapeDtypeStruct((B, Hgrid, W, Cout), out_dtype),
        grid=(B, nH),
        in_specs=in_specs,
        out_specs=pl.BlockSpec((1, tileH, W, Cout),
                               lambda bb, jj: (bb, jj, 0, 0)),
        scratch_shapes=[
            pltpu.VMEM((2, slab_rows, Wp, C), jnp.bfloat16),   # double-buffered slab
            pltpu.SemaphoreType.DMA((2,)),
        ],
        compiler_params=pltpu.CompilerParams(
            # batch axis megacore-parallel; H-tile axis carries the manual
            # prefetch chain -> "arbitrary".
            dimension_semantics=("parallel", "arbitrary"),
            vmem_limit_bytes=32 * 1024 * 1024),
    )(*args)
    if extra:
        out = out[:, :H]
    return out


# --------------------------- parameters (synthetic) --------------------------

def init_params(key, in_filters, out_filters, eps=1e-5):
    keys = iter(jax.random.split(key, 16))

    def conv_w(cin, cout, kh, kw):
        w = 0.1 * jax.random.normal(next(keys), (cout, cin, kh, kw), jnp.float32)
        b = 0.1 * jax.random.normal(next(keys), (cout,), jnp.float32)
        return w, b

    def bn(c):
        gamma = 1.0 + 0.1 * jax.random.normal(next(keys), (c,), jnp.float32)
        beta = 0.1 * jax.random.normal(next(keys), (c,), jnp.float32)
        mean = 0.1 * jax.random.normal(next(keys), (c,), jnp.float32)
        var = 1.0 + 0.1 * jax.random.uniform(next(keys), (c,), jnp.float32)
        scale = gamma / jnp.sqrt(var + eps)      # eval-mode BN folded
        shift = beta - mean * scale
        return scale, shift

    w1, b1 = conv_w(in_filters, out_filters, 1, 1)
    w2, b2 = conv_w(out_filters, out_filters, 3, 3)
    s1, t1 = bn(out_filters)
    w3, b3 = conv_w(out_filters, out_filters, 3, 3)
    s2, t2 = bn(out_filters)
    return dict(w1=w1, b1=b1, w2=w2, b2=b2, s1=s1, t1=t1,
                w3=w3, b3=b3, s2=s2, t2=t2)


def _flatten_3x3(w_oihw):
    # (Cout, Cin, 3, 3) -> (9*Cin, Cout) with index (ky*3+kx)*Cin + cin
    cout = w_oihw.shape[0]
    return jnp.transpose(w_oihw, (2, 3, 1, 0)).reshape(-1, cout)


# ----------------------------------- forward ---------------------------------

def res_context_block_forward(params, x):
    B, Cin, H, W = x.shape
    Co = params["b1"].shape[0]

    # NCHW -> NHWC once at the module boundary.
    xn = jnp.transpose(x, (0, 2, 3, 1))
    x_rows = xn.reshape(B * H * W, Cin).astype(jnp.bfloat16)
    w1 = jnp.transpose(params["w1"][:, :, 0, 0], (1, 0)).astype(jnp.bfloat16)
    shortcut = conv1x1_leaky(x_rows, w1, params["b1"]).reshape(B, H, W, Co)  # f32

    # conv2 (3x3, pad=1) + LeakyReLU + BN1; output kept bf16 (only ever used
    # as the bf16 matmul operand of conv3).
    w2 = _flatten_3x3(params["w2"]).astype(jnp.bfloat16)
    sc_pad = jnp.pad(shortcut.astype(jnp.bfloat16),
                     ((0, 0), (1, 1), (1, 1), (0, 0)))
    resA1 = conv3x3_fused(sc_pad, w2, params["b2"], params["s1"], params["t1"],
                          dil=1, H=H, W=W, out_dtype=jnp.bfloat16)

    # conv3 (3x3, dilation=2, pad=2) + LeakyReLU + BN2 + residual add (f32).
    w3 = _flatten_3x3(params["w3"]).astype(jnp.bfloat16)
    r_pad = jnp.pad(resA1, ((0, 0), (2, 2), (2, 2), (0, 0)))
    out = conv3x3_fused(r_pad, w3, params["b3"], params["s2"], params["t2"],
                        dil=2, H=H, W=W, residual=shortcut,
                        out_dtype=jnp.float32)

    # TODO(synk): drop / fuse this transpose if the downstream consumer is NHWC.
    return jnp.transpose(out, (0, 3, 1, 2))


# ------------------------------ pure-JAX references --------------------------

def res_context_block_reference(params, x, quantize=False):
    """quantize=True emulates the kernel's bf16 operand rounding (f32 accumulate),
       quantize=False is the pure-f32 PyTorch-equivalent reference."""
    if quantize:
        f = lambda a: a.astype(jnp.bfloat16)
    else:
        f = lambda a: a.astype(jnp.float32)

    xn = jnp.transpose(x, (0, 2, 3, 1))
    w1 = jnp.transpose(params["w1"][:, :, 0, 0], (1, 0))
    sc = _leaky(jnp.einsum("bhwc,co->bhwo", f(xn), f(w1),
                           preferred_element_type=jnp.float32,
                           precision=lax.Precision.HIGHEST) + params["b1"])

    def conv3x3(inp, w_flat, bias, pad, dil):
        B, H, W, C = inp.shape
        xp = jnp.pad(inp, ((0, 0), (pad, pad), (pad, pad), (0, 0)))
        cols = [xp[:, ky * dil:ky * dil + H, kx * dil:kx * dil + W, :]
                for ky in range(3) for kx in range(3)]
        m = jnp.concatenate(cols, axis=-1)
        return jnp.einsum("bhwk,ko->bhwo", m, f(w_flat),
                          preferred_element_type=jnp.float32,
                          precision=lax.Precision.HIGHEST) + bias

    r = _leaky(conv3x3(f(sc), _flatten_3x3(params["w2"]), params["b2"], 1, 1))
    r = r * params["s1"] + params["t1"]
    r = f(r)                                   # kernel stores resA1 as bf16
    r = _leaky(conv3x3(r, _flatten_3x3(params["w3"]), params["b3"], 2, 2))
    r = r * params["s2"] + params["t2"]
    return jnp.transpose(sc + r, (0, 3, 1, 2))


# ------------------------------------- main ----------------------------------

if __name__ == "__main__":
    key = jax.random.PRNGKey(0)
    k_param, k_x = jax.random.split(key)

    B, in_filters, out_filters, H, W = 2, 4, 32, 16, 16
    params = init_params(k_param, in_filters, out_filters)
    x = jax.random.normal(k_x, (B, in_filters, H, W), jnp.float32)

    out = jax.block_until_ready(res_context_block_forward(params, x))
    assert out.shape == (B, out_filters, H, W)

    # Tight check against a reference that emulates the same bf16 operand
    # rounding (isolates kernel bugs from deliberate quantization).
    ref_q = res_context_block_reference(params, x, quantize=True)
    np.testing.assert_allclose(np.asarray(out), np.asarray(ref_q),
                               rtol=1e-2, atol=1e-2)

    # Loose check against the pure-f32 module semantics (bf16 operand error).
    ref_f = res_context_block_reference(params, x, quantize=False)
    np.testing.assert_allclose(np.asarray(out), np.asarray(ref_f),
                               rtol=5e-2, atol=5e-2)

    print("KERNEL_OK")
</pallas_src>

<mosaic_0001>
module attributes {stable_mosaic.version = 11 : i64} {
  func.func @_pointwise_leaky_kernel(%arg0: i32, %arg1: memref<128x4xbf16, #tpu.memory_space<vmem>>, %arg2: memref<4x32xbf16, #tpu.memory_space<vmem>>, %arg3: memref<1x32xf32, #tpu.memory_space<vmem>>, %arg4: memref<128x32xf32, #tpu.memory_space<vmem>>) attributes {dimension_semantics = [#tpu.dimension_semantics<parallel>], iteration_bounds = array<i64: 4>, scalar_prefetch = 0 : i64, scratch_operands = 0 : i64, tpu.core_type = #tpu.core_type<tc>, window_params = [{transform_indices = @transform_0, window_bounds = array<i64: 128, 4>}, {pipeline_mode = #tpu.pipeline_mode<synchronous>, transform_indices = @transform_1, window_bounds = array<i64: 4, 32>}, {pipeline_mode = #tpu.pipeline_mode<synchronous>, transform_indices = @transform_2, window_bounds = array<i64: 1, 32>}, {transform_indices = @transform_3, window_bounds = array<i64: 128, 32>}]} {
    %c0 = arith.constant 0 : index
    %c0_0 = arith.constant 0 : index
    %0 = vector.load %arg1[%c0, %c0_0] : memref<128x4xbf16, #tpu.memory_space<vmem>>, vector<128x4xbf16>
    %c0_1 = arith.constant 0 : index
    %c0_2 = arith.constant 0 : index
    %1 = vector.load %arg2[%c0_1, %c0_2] : memref<4x32xbf16, #tpu.memory_space<vmem>>, vector<4x32xbf16>
    %cst = arith.constant dense<0.000000e+00> : vector<128x32xf32>
    %2 = tpu.matmul %0, %1, %cst {dimension_numbers = #tpu.dot_dimension_numbers<[1], [0], [0], [1], [0, 0, 1, 1], [], []>} : vector<128x4xbf16>, vector<4x32xbf16>, vector<128x32xf32> -> vector<128x32xf32>
    %c0_3 = arith.constant 0 : index
    %c0_4 = arith.constant 0 : index
    %3 = vector.load %arg3[%c0_3, %c0_4] : memref<1x32xf32, #tpu.memory_space<vmem>>, vector<1x32xf32>
    %4 = vector.broadcast %3 : vector<1x32xf32> to vector<128x32xf32>
    %5 = arith.addf %2, %4 : vector<128x32xf32>
    %cst_5 = arith.constant 0.00999999977 : f32
    %6 = vector.broadcast %cst_5 : f32 to vector<128x32xf32>
    %7 = arith.mulf %6, %5 : vector<128x32xf32>
    %8 = arith.maximumf %5, %7 : vector<128x32xf32>
    %c0_6 = arith.constant 0 : index
    %c0_7 = arith.constant 0 : index
    %9 = vector.load %arg4[%c0_6, %c0_7] : memref<128x32xf32, #tpu.memory_space<vmem>>, vector<128x32xf32>
    tpu.vector_store %arg4[%c0_6, %c0_7], %8 {strides = array<i32>} : memref<128x32xf32, #tpu.memory_space<vmem>>, vector<128x32xf32>,
    return
  }
  func.func @transform_0(%arg0: i32) -> (i32, i32) {
    %c0_i32 = arith.constant 0 : i32
    %c0_i32_0 = arith.constant 0 : i32
    return %arg0, %c0_i32 : i32, i32
  }
  func.func @transform_1(%arg0: i32) -> (i32, i32) {
    %c0_i32 = arith.constant 0 : i32
    %c0_i32_0 = arith.constant 0 : i32
    %c0_i32_1 = arith.constant 0 : i32
    return %c0_i32, %c0_i32_0 : i32, i32
  }
  func.func @transform_2(%arg0: i32) -> (i32, i32) {
    %c0_i32 = arith.constant 0 : i32
    %c0_i32_0 = arith.constant 0 : i32
    %c0_i32_1 = arith.constant 0 : i32
    return %c0_i32, %c0_i32_0 : i32, i32
  }
  func.func @transform_3(%arg0: i32) -> (i32, i32) {
    %c0_i32 = arith.constant 0 : i32
    %c0_i32_0 = arith.constant 0 : i32
    return %arg0, %c0_i32 : i32, i32
  }
}

</mosaic_0001>

<bundles_post_ra>
// kernel: tpu_custom_call.1
= control target key start
LH: loop header
LB: loop body
LE: loop exit
PB: predicated region body
PF: predicated region fallthrough
CT: control target
= control target key end

     0   :  { %s573_s12 = smov 0   ;;  %s660_s0 = inlined_call_operand.vmem [shape: bf16[512,4], index: 0, kind: input, shape index: {}]   ;;  %s661_s1 = inlined_call_operand.vmem [shape: bf16[4,32], index: 1, kind: input, shape index: {}]   ;;  %s662_s2 = inlined_call_operand.vmem [shape: f32[1,32], index: 2, kind: input, shape index: {}]   ;;  %s663_s3 = inlined_call_operand.vmem [shape: f32[512,32], index: 3, kind: output, shape index: {}]  }
   0x1 LB: > { %s470_s13 = sadd.s32 4294967295, %s551_s12   ;;  %p474_p0 = scmp.ge.s32.totalorder %s551_s12, 1  ;;  %s551_s12 = sphi %s573_s12, %s13_s12  }
   0x2   : > { %p138_p1 = scmp.lt.s32.totalorder %s551_s12, 5 }
   0x4   : > { %p139_p2 = pnand %p474_p0, %p138_p1 }
   0x5   : > { %v191_v0 = vld [vmem:[%s661_s1] sm:$0x3] (!%p139_p2)  ;;  %vm264_vm0 = vcmask (!%p139_p2), 1041408   ;;  %s475_s16 = sshll.u32 (!%p139_p2), %s470_s13, 4  ;;  %vm239_vm1 = vcmask (!%p139_p2), 31744   ;;  %vm397_vm2 = vcmask (!%p139_p2), 261120  }
   0x6   : > { %142 = sbr.rel (%p139_p2) target bundleno = 249 (0xf9), region = 32  ;;  %527 = vmatprep.subr.msk.bf16.mxu0 (!%p139_p2), %vm264_vm0, %v191_v0  ;;  %528 = vmatprep.subr.msk.bf16.mxu1 (!%p139_p2), %vm264_vm0, %v191_v0  ;;  %v266_v1 = vsel (!%p139_p2), %vm264_vm0, %v191_v0, 0  ;;  %p163_p3 = scmp.lt.s32.totalorder (!%p139_p2), %s475_s16, 63  ;;  %v601_v10 = vld [vmem:[%s662_s2] ss:$0 sm:$0xff] (!%p139_p2) }
   0x7   : > { %508 = vmatpush3.bf16.msra.mxu0 (!%p139_p2), %v266_v1  ;;  %526 = vmatpush3.bf16.msra.mxu1 (!%p139_p2), %v266_v1 }
   0xd   : > { %s665_s16 = smov (!%p163_p3, %s475_s16), 63 }
   0xe   : > { %s476_s17 = sshll.u32 %s665_s16, 2  ;;  %s478_s23 = sshll.u32 %s665_s16, 3 }
   0xf   : > { %s166_s20 = scalar_lea.vmem %s660_s0, %s476_s17  ;;  %s612_s26 = scalar_lea.vmem %s663_s3, %s478_s23 }
  0x10   : > { %v537_v2 = vld [vmem:[%s166_s20] sm:$0xff]   ;;  %v539_v4 = vld [vmem:[%s166_s20 + $0x8] sm:$0xff]   ;;  %v541_v6 = vld [vmem:[%s166_s20 + $0x10] sm:$0xff]  }
  0x11   : > { %v538_v3 = vld [vmem:[%s166_s20 + $0x20] sm:$0xff]   ;;  %509 = vmatprep.mubr.msk.bf16.mxu0 %vm239_vm1, %v537_v2  ;;  %v540_v5 = vld [vmem:[%s166_s20 + $0x28] sm:$0xff]   ;;  %v542_v7 = vld [vmem:[%s166_s20 + $0x30] sm:$0xff]  }
  0x12   : > { %517 = vmatprep.mubr.msk.bf16.mxu1 %vm239_vm1, %v538_v3  ;;  %510 = vmatmul.mubr.msk.bf16.vlgmr.msra.gmra.mrb[0].mxu0 %vm239_vm1, %v539_v4  ;;  %v543_v8 = vld [vmem:[%s166_s20 + $0x18] sm:$0xff]  }
  0x13   : > { %518 = vmatmul.mubr.msk.bf16.vlgmr.msra.gmra.mrb[0].mxu1 %vm239_vm1, %v540_v5  ;;  %513 = vmatprep.mubr.msk.bf16.mxu0 %vm239_vm1, %v541_v6  ;;  %v544_v9 = vld [vmem:[%s166_s20 + $0x38] sm:$0xff]  }
  0x14   : > { %521 = vmatprep.mubr.msk.bf16.mxu1 %vm239_vm1, %v542_v7 }
  0x1a   : > { %514 = vmatmul.mubr.msk.bf16.gmra.mrb[4].mxu0 %vm239_vm1, %v543_v8 }
  0x1b   : > { %522 = vmatmul.mubr.msk.bf16.gmra.mrb[4].mxu1 %vm239_vm1, %v544_v9 }
  0xe5   : > { %v511_v11 = vpop.f32.mrb[0].mxu0 }
  0xe6   : > { %v311_v12 = vadd.f32 %v511_v11, %v601_v10  ;;  %v519_v13 = vpop.f32.mrb[0].mxu1  ;;  %v302_v14 = vpop.f32.mrb[1].mxu0 }
  0xe7   : > { %v343_v15 = vadd.f32 %v519_v13, %v601_v10  ;;  %v303_v16 = vadd.f32 %v601_v10, %v302_v14  ;;  %v334_v17 = vpop.f32.mrb[1].mxu1  ;;  %v512_v18 = vpop.f32.mrb[2].mxu0 }
  0xe8   : > { %v367_v19 = vmul.f32 0.01, %v311_v12  ;;  %v335_v20 = vadd.f32 %v601_v10, %v334_v17  ;;  %v314_v21 = vadd.f32 %v512_v18, %v601_v10  ;;  %v520_v22 = vpop.f32.mrb[2].mxu1  ;;  %v305_v23 = vpop.f32.mrb[3].mxu0 }
  0xe9   : > { %v375_v24 = vmul.f32 0.01, %v343_v15  ;;  %v365_v25 = vmul.f32 0.01, %v303_v16  ;;  %v346_v26 = vadd.f32 %v520_v22, %v601_v10  ;;  %v306_v27 = vadd.f32 %v601_v10, %v305_v23  ;;  %v337_v28 = vpop.f32.mrb[3].mxu1 }
  0xea   : > { %v383_v29 = vmax.f32 %v311_v12, %v367_v19  ;;  %v373_v30 = vmul.f32 0.01, %v335_v20  ;;  %v368_v31 = vmul.f32 0.01, %v314_v21  ;;  %v338_v32 = vadd.f32 %v601_v10, %v337_v28 }
  0xeb   : > { %v391_v33 = vmax.f32 %v343_v15, %v375_v24  ;;  %v381_v34 = vmax.f32 %v303_v16, %v365_v25  ;;  %v376_v35 = vmul.f32 0.01, %v346_v26  ;;  %v366_v36 = vmul.f32 0.01, %v306_v27 }
  0xec   : > { %400 = vst.msk [vmem:[%s612_s26 + $0x10] sm:$0xff] %vm397_vm2, %v383_v29  ;;  %v389_v37 = vmax.f32 %v335_v20, %v373_v30  ;;  %v384_v38 = vmax.f32 %v314_v21, %v368_v31  ;;  %v374_v39 = vmul.f32 0.01, %v338_v32 }
  0xed   : > { %408 = vst.msk [vmem:[%s612_s26 + $0x50] sm:$0xff] %vm397_vm2, %v391_v33  ;;  %398 = vst.msk [vmem:[%s612_s26] sm:$0xff] %vm397_vm2, %v381_v34  ;;  %v392_v40 = vmax.f32 %v346_v26, %v376_v35  ;;  %v382_v41 = vmax.f32 %v306_v27, %v366_v36  ;;  %v515_v42 = vpop.f32.mrb[4].mxu0 }
  0xee   : > { %406 = vst.msk [vmem:[%s612_s26 + $0x40] sm:$0xff] %vm397_vm2, %v389_v37  ;;  %401 = vst.msk [vmem:[%s612_s26 + $0x18] sm:$0xff] %vm397_vm2, %v384_v38  ;;  %v390_v43 = vmax.f32 %v338_v32, %v374_v39  ;;  %v327_v44 = vadd.f32 %v515_v42, %v601_v10  ;;  %v523_v45 = vpop.f32.mrb[4].mxu1  ;;  %v318_v46 = vpop.f32.mrb[5].mxu0 }
  0xef   : > { %409 = vst.msk [vmem:[%s612_s26 + $0x58] sm:$0xff] %vm397_vm2, %v392_v40  ;;  %399 = vst.msk [vmem:[%s612_s26 + $0x8] sm:$0xff] %vm397_vm2, %v382_v41  ;;  %v359_v47 = vadd.f32 %v523_v45, %v601_v10  ;;  %v319_v48 = vadd.f32 %v601_v10, %v318_v46  ;;  %v350_v49 = vpop.f32.mrb[5].mxu1  ;;  %v516_v50 = vpop.f32.mrb[6].mxu0 }
  0xf0   : > { %407 = vst.msk [vmem:[%s612_s26 + $0x48] sm:$0xff] %vm397_vm2, %v390_v43  ;;  %v371_v51 = vmul.f32 0.01, %v327_v44  ;;  %v351_v52 = vadd.f32 %v601_v10, %v350_v49  ;;  %v330_v53 = vadd.f32 %v516_v50, %v601_v10  ;;  %v524_v54 = vpop.f32.mrb[6].mxu1  ;;  %v321_v55 = vpop.f32.mrb[7].mxu0 }
  0xf1   : > { %v379_v56 = vmul.f32 0.01, %v359_v47  ;;  %v369_v57 = vmul.f32 0.01, %v319_v48  ;;  %v362_v58 = vadd.f32 %v524_v54, %v601_v10  ;;  %v322_v59 = vadd.f32 %v601_v10, %v321_v55  ;;  %v353_v60 = vpop.f32.mrb[7].mxu1 }
  0xf2   : > { %v387_v61 = vmax.f32 %v327_v44, %v371_v51  ;;  %v377_v62 = vmul.f32 0.01, %v351_v52  ;;  %v372_v63 = vmul.f32 0.01, %v330_v53  ;;  %v354_v0 = vadd.f32 %v601_v10, %v353_v60 }
  0xf3   : > { %v395_v1 = vmax.f32 %v359_v47, %v379_v56  ;;  %v385_v2 = vmax.f32 %v319_v48, %v369_v57  ;;  %v380_v3 = vmul.f32 0.01, %v362_v58  ;;  %v370_v4 = vmul.f32 0.01, %v322_v59 }
  0xf4   : > { %404 = vst.msk [vmem:[%s612_s26 + $0x30] sm:$0xff] %vm397_vm2, %v387_v61  ;;  %v393_v5 = vmax.f32 %v351_v52, %v377_v62  ;;  %v388_v6 = vmax.f32 %v330_v53, %v372_v63  ;;  %v378_v7 = vmul.f32 0.01, %v354_v0 }
  0xf5   : > { %412 = vst.msk [vmem:[%s612_s26 + $0x70] sm:$0xff] %vm397_vm2, %v395_v1  ;;  %402 = vst.msk [vmem:[%s612_s26 + $0x20] sm:$0xff] %vm397_vm2, %v385_v2  ;;  %v396_v8 = vmax.f32 %v362_v58, %v380_v3  ;;  %v386_v9 = vmax.f32 %v322_v59, %v370_v4 }
  0xf6   : > { %410 = vst.msk [vmem:[%s612_s26 + $0x60] sm:$0xff] %vm397_vm2, %v393_v5  ;;  %405 = vst.msk [vmem:[%s612_s26 + $0x38] sm:$0xff] %vm397_vm2, %v388_v6  ;;  %v394_v10 = vmax.f32 %v354_v0, %v378_v7 }
  0xf7   : > { %413 = vst.msk [vmem:[%s612_s26 + $0x78] sm:$0xff] %vm397_vm2, %v396_v8  ;;  %403 = vst.msk [vmem:[%s612_s26 + $0x28] sm:$0xff] %vm397_vm2, %v386_v9 }
  0xf8   : > { %411 = vst.msk [vmem:[%s612_s26 + $0x68] sm:$0xff] %vm397_vm2, %v394_v10 }
  0xf9 PF: > { %s13_s12 = sadd.s32 1, %s551_s12  }
  0xfa   : > { %p10_p4 = scmp.ge.s32.totalorder %s13_s12, 6  }
  0xfc   :  { %12 = sbr.rel (!%p10_p4) target bundleno = 1 (0x1), region = 62 }

</bundles_post_ra>
